<compile_context>
chip_gen: v7x
topology: tpu7x:2x2x1
jax: 0.10.0
libtpu: 0.0.40
codegen_flags: <defaults>
</compile_context>

<pallas_src>
import functools

import jax
import jax.numpy as jnp
from jax.experimental import pallas as pl
from jax.experimental.pallas import tpu as pltpu

_SUBLANE_F32 = 8
_SUBLANE_BF16 = 16


def _round_up(n, m):
    return ((n + m - 1) // m) * m


def _mlp_kernel(n_hidden, *refs):
    """refs = (x_ref, w0, b0, w1, b1, ..., w_last, b_last, out_ref).

    One batch tile per grid step; all weights/biases are VMEM-resident across
    the whole grid (constant index_maps).  MXU for dots (f32 accumulation),
    EUP for tanh, bias add always in f32.  If the weights were pre-cast to
    bf16 host-side, only the activation tile is cast in-kernel.
    """
    x_ref = refs[0]
    out_ref = refs[-1]
    wb_refs = refs[1:-1]

    def linear(a, w_ref, b_ref):
        w = w_ref[...]
        if w.dtype == jnp.bfloat16:
            a = a.astype(jnp.bfloat16)          # weights already bf16 (pre-cast once)
        y = jnp.dot(a, w, preferred_element_type=jnp.float32)
        return y + b_ref[...]                   # (1, N) bias row: free sublane broadcast

    x = x_ref[...].astype(jnp.float32)
    for i in range(n_hidden):
        x = jnp.tanh(linear(x, wb_refs[2 * i], wb_refs[2 * i + 1]))
    out_ref[...] = linear(x, wb_refs[2 * n_hidden], wb_refs[2 * n_hidden + 1]).astype(
        out_ref.dtype)


def prepare_mlp_params(weights, biases, *, use_bf16=False):
    """One-time parameter preparation (hoisted out of every forward call).

    * biases -> (1, N) rows so they broadcast along sublanes for free.
    * optional bf16 pre-cast of weights (bias stays f32; matmul accumulates f32).
      NOTE: the bf16 path trades accuracy (~1e-2 rel) for v6e/v7x MXU peak.
    """
    ws, bs = [], []
    for w, b in zip(weights, biases):
        ws.append(w.astype(jnp.bfloat16) if use_bf16 else w)
        bs.append(jnp.reshape(b, (1, -1)).astype(jnp.float32))
    return ws, bs


def mlp_forward(x, weights, biases, *, block_batch=2048, core_parallel=False):
    """weights[i]: [in_i, out_i] (transposed vs. PyTorch), biases[i]: (1, out_i) or (out_i,)."""
    n_layers = len(weights)
    n_hidden = n_layers - 1
    batch, in_dim = x.shape
    out_dim = weights[-1].shape[1]
    use_bf16 = weights[0].dtype == jnp.bfloat16

    # Accept raw 1-D biases too, but prefer prepare_mlp_params (hoisted prep).
    biases = [b if b.ndim == 2 else jnp.reshape(b, (1, -1)) for b in biases]

    sublane = _SUBLANE_BF16 if use_bf16 else _SUBLANE_F32

    if batch <= block_batch:
        # Single grid step: block = full array in both dims -> no (8,128)
        # constraint, no batch padding, no output slicing, no step overhead.
        tb = batch
        padded_batch = batch
        x_in = x
    else:
        tb = _round_up(min(block_batch, batch), sublane)
        padded_batch = _round_up(batch, tb)
        x_in = x
        if padded_batch != batch:
            # Only the batch axis is padded (feature dims stay un-padded).
            x_in = jnp.zeros((padded_batch, in_dim), x.dtype).at[:batch].set(x)

    grid = (padded_batch // tb,)

    args = [x_in]
    in_specs = [pl.BlockSpec((tb, in_dim), lambda i: (i, 0))]
    for w, b in zip(weights, biases):
        args.append(w)
        args.append(b)
        # Weights/biases stay VMEM-resident across all batch tiles (constant
        # index map -> Pallas does not re-DMA them per step).
        # TODO(synk): on v7x, pipeline_mode=pl.Buffered(1) on these specs would
        # drop the pointless double-buffer of constant-indexed params.
        in_specs.append(pl.BlockSpec(w.shape, lambda i: (0, 0)))
        in_specs.append(pl.BlockSpec(b.shape, lambda i: (0, 0)))

    # Explicit VMEM budget: resident params (x2 buffering) + in/out tiles (x2)
    # + activation headroom.  Floor at 32 MiB (v5e default scoped is 16 MiB),
    # cap at 64 MiB (v7x physical per-TC).
    param_bytes = sum(w.size * w.dtype.itemsize + b.size * b.dtype.itemsize
                      for w, b in zip(weights, biases))
    widths = [in_dim] + [w.shape[1] for w in weights]
    act_bytes = tb * max(widths) * 4
    est = (2 * param_bytes
           + 2 * tb * in_dim * x.dtype.itemsize
           + 2 * tb * out_dim * jnp.dtype(x.dtype).itemsize
           + 8 * act_bytes
           + (4 << 20))
    vmem_limit = int(min(max(est, 32 << 20), 64 << 20))

    # v7x: pass core_parallel=True to split batch tiles across both TensorCores.
    batch_sem = pltpu.CORE_PARALLEL if core_parallel else "parallel"

    kernel = functools.partial(_mlp_kernel, n_hidden)
    out = pl.pallas_call(
        kernel,
        out_shape=jax.ShapeDtypeStruct((padded_batch, out_dim), x.dtype),
        grid_spec=pltpu.PrefetchScalarGridSpec(
            num_scalar_prefetch=0,
            grid=grid,
            in_specs=in_specs,
            out_specs=pl.BlockSpec((tb, out_dim), lambda i: (i, 0)),
        ),
        compiler_params=pltpu.CompilerParams(
            dimension_semantics=(batch_sem,),
            vmem_limit_bytes=vmem_limit,
        ),
    )(*args)

    if padded_batch != batch:
        out = out[:batch]
    return out


def init_mlp_params(key, input_dim, output_dim, hidden_dims):
    """Deterministic synthetic init matching the MLP layer shapes."""
    sizes = [input_dim] + list(hidden_dims)
    weights, biases = [], []
    for i in range(len(sizes) - 1):
        key, kw, kb = jax.random.split(key, 3)
        bound = 1.0 / jnp.sqrt(sizes[i])
        # stored as [in, out] (transpose of torch's [out, in])
        weights.append(jax.random.uniform(kw, (sizes[i], sizes[i + 1]),
                                          jnp.float32, -bound, bound))
        biases.append(jax.random.uniform(kb, (sizes[i + 1],),
                                         jnp.float32, -bound, bound))
    key, kw, kb = jax.random.split(key, 3)
    bound = 1.0 / jnp.sqrt(sizes[-1])
    weights.append(jax.random.uniform(kw, (sizes[-1], output_dim),
                                      jnp.float32, -bound, bound))
    biases.append(jax.random.uniform(kb, (output_dim,),
                                     jnp.float32, -bound, bound))
    return weights, biases


def mlp_reference(x, weights, biases):
    """Pure-JAX reference of the PyTorch forward (tanh hidden, identity last)."""
    n_hidden = len(weights) - 1
    for i in range(n_hidden):
        x = jnp.tanh(x @ weights[i] + biases[i])
    return x @ weights[-1] + biases[-1]


if __name__ == "__main__":
    key = jax.random.PRNGKey(0)
    batch, input_dim, output_dim = 8, 16, 8
    hidden_dims = [32, 32]

    key, kx = jax.random.split(key)
    x = jax.random.normal(kx, (batch, input_dim), jnp.float32)
    weights, biases = init_mlp_params(key, input_dim, output_dim, hidden_dims)

    # One-time, hoisted parameter prep (bias rows; no per-call padding/casting).
    w_prep, b_prep = prepare_mlp_params(weights, biases)

    # Small batch: single grid step, zero padding, zero slicing.
    out = mlp_forward(x, w_prep, b_prep)
    jax.block_until_ready(out)
    ref = mlp_reference(x, weights, biases)
    assert out.shape == (batch, output_dim)
    assert jnp.allclose(out, ref, atol=1e-5, rtol=1e-5)

    # Larger batch with an explicit small tile to exercise the batch-tiled,
    # software-pipelined path (only the batch axis is padded, then sliced).
    key, kx2 = jax.random.split(key)
    x_big = jax.random.normal(kx2, (1000, input_dim), jnp.float32)
    out_big = mlp_forward(x_big, w_prep, b_prep, block_batch=128)
    jax.block_until_ready(out_big)
    ref_big = mlp_reference(x_big, weights, biases)
    assert out_big.shape == (1000, output_dim)
    assert jnp.allclose(out_big, ref_big, atol=1e-5, rtol=1e-5)

    # Opt-in bf16 matmul path: weights pre-cast once host-side, f32 accumulation.
    # Documented looser tolerance vs. the f32 reference.
    w_bf16, b_bf16 = prepare_mlp_params(weights, biases, use_bf16=True)
    out_bf = mlp_forward(x_big, w_bf16, b_bf16)
    jax.block_until_ready(out_bf)
    assert out_bf.shape == (1000, output_dim)
    assert jnp.allclose(out_bf, ref_big, atol=5e-2, rtol=5e-2)

    print("KERNEL_OK")
</pallas_src>

<mosaic_0001>
module attributes {stable_mosaic.version = 11 : i64} {
  func.func @_mlp_kernel(%arg0: i32, %arg1: memref<8x16xf32, #tpu.memory_space<vmem>>, %arg2: memref<16x32xf32, #tpu.memory_space<vmem>>, %arg3: memref<1x32xf32, #tpu.memory_space<vmem>>, %arg4: memref<32x32xf32, #tpu.memory_space<vmem>>, %arg5: memref<1x32xf32, #tpu.memory_space<vmem>>, %arg6: memref<32x8xf32, #tpu.memory_space<vmem>>, %arg7: memref<1x8xf32, #tpu.memory_space<vmem>>, %arg8: memref<8x8xf32, #tpu.memory_space<vmem>>) attributes {dimension_semantics = [#tpu.dimension_semantics<parallel>], iteration_bounds = array<i64: 1>, scalar_prefetch = 0 : i64, scratch_operands = 0 : i64, tpu.core_type = #tpu.core_type<tc>, window_params = [{transform_indices = @transform_0, window_bounds = array<i64: 8, 16>}, {pipeline_mode = #tpu.pipeline_mode<synchronous>, transform_indices = @transform_1, window_bounds = array<i64: 16, 32>}, {pipeline_mode = #tpu.pipeline_mode<synchronous>, transform_indices = @transform_2, window_bounds = array<i64: 1, 32>}, {pipeline_mode = #tpu.pipeline_mode<synchronous>, transform_indices = @transform_3, window_bounds = array<i64: 32, 32>}, {pipeline_mode = #tpu.pipeline_mode<synchronous>, transform_indices = @transform_4, window_bounds = array<i64: 1, 32>}, {pipeline_mode = #tpu.pipeline_mode<synchronous>, transform_indices = @transform_5, window_bounds = array<i64: 32, 8>}, {pipeline_mode = #tpu.pipeline_mode<synchronous>, transform_indices = @transform_6, window_bounds = array<i64: 1, 8>}, {transform_indices = @transform_7, window_bounds = array<i64: 8, 8>}]} {
    %c0 = arith.constant 0 : index
    %c0_0 = arith.constant 0 : index
    %0 = vector.load %arg1[%c0, %c0_0] : memref<8x16xf32, #tpu.memory_space<vmem>>, vector<8x16xf32>
    %c0_1 = arith.constant 0 : index
    %c0_2 = arith.constant 0 : index
    %1 = vector.load %arg2[%c0_1, %c0_2] : memref<16x32xf32, #tpu.memory_space<vmem>>, vector<16x32xf32>
    %cst = arith.constant dense<0.000000e+00> : vector<8x32xf32>
    %2 = tpu.matmul %0, %1, %cst {dimension_numbers = #tpu.dot_dimension_numbers<[1], [0], [0], [1], [0, 0, 1, 1], [], []>} : vector<8x16xf32>, vector<16x32xf32>, vector<8x32xf32> -> vector<8x32xf32>
    %c0_3 = arith.constant 0 : index
    %c0_4 = arith.constant 0 : index
    %3 = vector.load %arg3[%c0_3, %c0_4] : memref<1x32xf32, #tpu.memory_space<vmem>>, vector<1x32xf32>
    %4 = vector.broadcast %3 : vector<1x32xf32> to vector<8x32xf32>
    %5 = arith.addf %2, %4 : vector<8x32xf32>
    %6 = math.tanh %5 : vector<8x32xf32>
    %c0_5 = arith.constant 0 : index
    %c0_6 = arith.constant 0 : index
    %7 = vector.load %arg4[%c0_5, %c0_6] : memref<32x32xf32, #tpu.memory_space<vmem>>, vector<32x32xf32>
    %cst_7 = arith.constant dense<0.000000e+00> : vector<8x32xf32>
    %8 = tpu.matmul %6, %7, %cst_7 {dimension_numbers = #tpu.dot_dimension_numbers<[1], [0], [0], [1], [0, 0, 1, 1], [], []>} : vector<8x32xf32>, vector<32x32xf32>, vector<8x32xf32> -> vector<8x32xf32>
    %c0_8 = arith.constant 0 : index
    %c0_9 = arith.constant 0 : index
    %9 = vector.load %arg5[%c0_8, %c0_9] : memref<1x32xf32, #tpu.memory_space<vmem>>, vector<1x32xf32>
    %10 = vector.broadcast %9 : vector<1x32xf32> to vector<8x32xf32>
    %11 = arith.addf %8, %10 : vector<8x32xf32>
    %12 = math.tanh %11 : vector<8x32xf32>
    %c0_10 = arith.constant 0 : index
    %c0_11 = arith.constant 0 : index
    %13 = vector.load %arg6[%c0_10, %c0_11] : memref<32x8xf32, #tpu.memory_space<vmem>>, vector<32x8xf32>
    %cst_12 = arith.constant dense<0.000000e+00> : vector<8x8xf32>
    %14 = tpu.matmul %12, %13, %cst_12 {dimension_numbers = #tpu.dot_dimension_numbers<[1], [0], [0], [1], [0, 0, 1, 1], [], []>} : vector<8x32xf32>, vector<32x8xf32>, vector<8x8xf32> -> vector<8x8xf32>
    %c0_13 = arith.constant 0 : index
    %c0_14 = arith.constant 0 : index
    %15 = vector.load %arg7[%c0_13, %c0_14] : memref<1x8xf32, #tpu.memory_space<vmem>>, vector<1x8xf32>
    %16 = vector.broadcast %15 : vector<1x8xf32> to vector<8x8xf32>
    %17 = arith.addf %14, %16 : vector<8x8xf32>
    %c0_15 = arith.constant 0 : index
    %c0_16 = arith.constant 0 : index
    %18 = vector.load %arg8[%c0_15, %c0_16] : memref<8x8xf32, #tpu.memory_space<vmem>>, vector<8x8xf32>
    tpu.vector_store %arg8[%c0_15, %c0_16], %17 {strides = array<i32>} : memref<8x8xf32, #tpu.memory_space<vmem>>, vector<8x8xf32>,
    return
  }
  func.func @transform_0(%arg0: i32) -> (i32, i32) {
    %c0_i32 = arith.constant 0 : i32
    %c0_i32_0 = arith.constant 0 : i32
    return %arg0, %c0_i32 : i32, i32
  }
  func.func @transform_1(%arg0: i32) -> (i32, i32) {
    %c0_i32 = arith.constant 0 : i32
    %c0_i32_0 = arith.constant 0 : i32
    %c0_i32_1 = arith.constant 0 : i32
    return %c0_i32, %c0_i32_0 : i32, i32
  }
  func.func @transform_2(%arg0: i32) -> (i32, i32) {
    %c0_i32 = arith.constant 0 : i32
    %c0_i32_0 = arith.constant 0 : i32
    %c0_i32_1 = arith.constant 0 : i32
    return %c0_i32, %c0_i32_0 : i32, i32
  }
  func.func @transform_3(%arg0: i32) -> (i32, i32) {
    %c0_i32 = arith.constant 0 : i32
    %c0_i32_0 = arith.constant 0 : i32
    %c0_i32_1 = arith.constant 0 : i32
    return %c0_i32, %c0_i32_0 : i32, i32
  }
  func.func @transform_4(%arg0: i32) -> (i32, i32) {
    %c0_i32 = arith.constant 0 : i32
    %c0_i32_0 = arith.constant 0 : i32
    %c0_i32_1 = arith.constant 0 : i32
    return %c0_i32, %c0_i32_0 : i32, i32
  }
  func.func @transform_5(%arg0: i32) -> (i32, i32) {
    %c0_i32 = arith.constant 0 : i32
    %c0_i32_0 = arith.constant 0 : i32
    %c0_i32_1 = arith.constant 0 : i32
    return %c0_i32, %c0_i32_0 : i32, i32
  }
  func.func @transform_6(%arg0: i32) -> (i32, i32) {
    %c0_i32 = arith.constant 0 : i32
    %c0_i32_0 = arith.constant 0 : i32
    %c0_i32_1 = arith.constant 0 : i32
    return %c0_i32, %c0_i32_0 : i32, i32
  }
  func.func @transform_7(%arg0: i32) -> (i32, i32) {
    %c0_i32 = arith.constant 0 : i32
    %c0_i32_0 = arith.constant 0 : i32
    return %arg0, %c0_i32 : i32, i32
  }
}

</mosaic_0001>

<bundles_post_ra>
// kernel: tpu_custom_call.1
= control target key start
LH: loop header
LB: loop body
LE: loop exit
PB: predicated region body
PF: predicated region fallthrough
CT: control target
= control target key end

     0   :  { %12 = vsyncpa [#allocation3], 0  ;;  %s541_s0 = inlined_call_operand.hbm [shape: f32[8,16], index: 0, kind: input, shape index: {}]   ;;  %s542_s1 = inlined_call_operand.vmem [shape: f32[16,32], index: 1, kind: input, shape index: {}]   ;;  %s543_s2 = inlined_call_operand.vmem [shape: f32[1,32], index: 2, kind: input, shape index: {}]   ;;  %s544_s3 = inlined_call_operand.vmem [shape: f32[32,32], index: 3, kind: input, shape index: {}]   ;;  %s545_s4 = inlined_call_operand.vmem [shape: f32[1,32], index: 4, kind: input, shape index: {}]   ;;  %s546_s5 = inlined_call_operand.vmem [shape: f32[32,8], index: 5, kind: input, shape index: {}]   ;;  %s547_s6 = inlined_call_operand.vmem [shape: f32[1,8], index: 6, kind: input, shape index: {}]   ;;  %s548_s7 = inlined_call_operand.hbm [shape: f32[8,8], index: 7, kind: output, shape index: {}]  }
   0x1   :  { %13 = vsyncpa [#allocation4], 0  ;;  %s431_s24 = smov [#allocation2]   ;;  %s383_s28 = scalar_lea.hbm %s541_s0, 128 }
   0x2   :  { %s20_s25 = sshll.u32 %s431_s24, 4  ;;  %p384_p0 = scmp.ne.s32.totalorder %s541_s0, %s383_s28  ;;  %s21_s25 = int_to_ptr.vmem [resolvable:$true] %s20_s25 }
   0x3   :  { %p387_p1 = scmp.lt.u32.totalorder %s383_s28, %s541_s0 }
   0x5   :  { %p389_p2 = pnand %p387_p1, %p384_p0 }
   0x7   :  { %392 = shalt.err (!%p389_p2)
}
   0x8   :  { %s393_s10 = scalar_lea.vmem %s21_s25, 128  ;;  %p398_p4 = scmp.lt.s32.totalorder %s21_s25, %s21_s25 }
   0x9   :  { %p394_p3 = scmp.ne.s32.totalorder %s21_s25, %s393_s10  ;;  %p399_p5 = scmp.lt.s32.totalorder %s393_s10, %s393_s10 }
   0xb   :  { %p400_p6 = por %p399_p5, %p398_p4 }
   0xd   :  { %p401_p7 = pnand %p400_p6, %p394_p3 }
   0xf   :  { %404 = shalt.err (!%p401_p7)
}
  0x10   :  { %23 = dma.hbm_to_vmem [thread:$0]  %s541_s0, 128, %s21_s25, [#allocation3]  }
  0x11   :  { %427 = dma.done.wait [#allocation3], 128  }
  0x12   :  { %428 = vsyncadd [#allocation3], 4294967168  ;;  %v432_v0 = vmov 0.0|0.0   ;;  %vm433_vm0 = vmmov 0   ;;  %v434_v1 = vmov 0.0   ;;  %v40_v2 = vld [vmem:[%s542_s1] sm:$0xff] }
  0x13   :  { %359 = vmatprep.subr.bf16.mxu0 %v432_v0  ;;  %334 = vmatprep.mubr.msk.f32.mxu0 %vm433_vm0, %v434_v1  ;;  %v41_v3 = vld [vmem:[%s542_s1 + $0x8] sm:$0xff]  ;;  %v39_v5 = vld [vmem:[#allocation2] sm:$0xff]  ;;  %vm49_vm1 = vcmask 130048   ;;  %v126_v8 = vld [vmem:[%s544_s3 + $0x10] sm:$0xff]  ;;  %vm135_vm2 = vcmask 261120   ;;  %vm294_vm3 = vcmask 64512  }
  0x14   :  { %362 = vmatprep.subr.bf16.mxu1 %v432_v0  ;;  %345 = vmatprep.mubr.msk.f32.mxu1 %vm433_vm0, %v434_v1  ;;  %v360_v4 = vpack.c.bf16 %v41_v3, %v40_v2  ;;  %v124_v6 = vld [vmem:[%s544_s3] sm:$0xff]  ;;  %v125_v7 = vld [vmem:[%s544_s3 + $0x8] sm:$0xff]  ;;  %v127_v10 = vld [vmem:[%s544_s3 + $0x18] sm:$0xff] }
  0x15   :  { %v363_v9 = vpack.c.bf16 %v125_v7, %v124_v6  ;;  %v366_v11 = vpack.c.bf16 %v127_v10, %v126_v8  ;;  %v311_v12 = vld [vmem:[%s543_s2] ss:$0 sm:$0xff]  ;;  %v211_v18 = vld [vmem:[%s546_s5 + $0x8] sm:$0xff]  ;;  %v212_v19 = vld [vmem:[%s546_s5 + $0x10] sm:$0xff] }
  0x16   :  { %361 = vmatpush3.bf16.msra.mxu0 %v360_v4  ;;  %v210_v17 = vld [vmem:[%s546_s5] sm:$0xff]  ;;  %v213_v21 = vld [vmem:[%s546_s5 + $0x18] sm:$0xff]  ;;  %s435_s5 = smov [#allocation5]  }
  0x17   :  { %368 = vmatprep.subr.bf16.mxu0 %v432_v0  ;;  %364 = vmatpush3.bf16.msra.mxu1 %v363_v9  ;;  %v369_v20 = vpack.c.bf16 %v211_v18, %v210_v17  ;;  %v372_v22 = vpack.c.bf16 %v213_v21, %v212_v19  ;;  %v313_v23 = vld [vmem:[%s545_s4] ss:$0 sm:$0xff]  ;;  %s302_s12 = sshll.u32 %s435_s5, 4  ;;  %s303_s12 = int_to_ptr.vmem [resolvable:$true] %s302_s12 }
  0x18   :  { %365 = vmatprep.subr.bf16.mxu1 %v432_v0  ;;  %v315_v28 = vld [vmem:[%s547_s6] ss:$0 sm:$0xff]  ;;  %s405_s4 = scalar_lea.vmem %s303_s12, 128  ;;  %p410_p9 = scmp.lt.s32.totalorder %s303_s12, %s303_s12 }
  0x19   :  { %335 = vmatmul.mubr.msk.f32.vlgmr.msra.gmra.mrb[0].mxu0 %vm49_vm1, %v39_v5  ;;  %p406_p8 = scmp.ne.s32.totalorder %s303_s12, %s405_s4  ;;  %p411_p10 = scmp.lt.s32.totalorder %s405_s4, %s405_s4 }
  0x1a   :  { %356 = vmatprep.mubr.msk.f32.mxu0 %vm433_vm0, %v434_v1  ;;  %370 = vmatpush3.bf16.msra.mxu0 %v369_v20 }
  0x1b   :  { %367 = vmatpush3.bf16.msra.mxu1 %v366_v11  ;;  %371 = vmatprep.subr.bf16.mxu0 %v432_v0  ;;  %p412_p11 = por %p411_p10, %p410_p9 }
  0x1d   :  { %p413_p12 = pnand %p412_p11, %p406_p8 }
  0x1e   :  { %373 = vmatpush3.bf16.msra.mxu0 %v372_v22 }
  0xec   :  { %v119_v13 = vpop.f32.mrb[0].mxu0 }
  0xed   :  { %v120_v14 = vadd.f32 %v311_v12, %v119_v13  ;;  %v336_v15 = vpop.f32.mrb[1].mxu0 }
  0xef   :  { %379 = vtanh.f32 %v120_v14 }
  0xf9   :  { %v380_v16 = vpop.eup %379 }
  0xfa   :  { %346 = vmatmul.mubr.msk.f32.vlgmr.msra.gmra.mrb[0].mxu1 %vm135_vm2, %v380_v16 }
 0x1cd   :  { %v205_v24 = vpop.f32.mrb[0].mxu1 }
 0x1ce   :  { %v206_v25 = vadd.f32 %v313_v23, %v205_v24  ;;  %v347_v26 = vpop.f32.mrb[1].mxu1 }
 0x1d0   :  { %381 = vtanh.f32 %v206_v25 }
 0x1da   :  { %v382_v27 = vpop.eup %381 }
 0x1db   :  { %357 = vmatmul.mubr.msk.f32.vlgmr.msra.gmra.mrb[2].mxu0 %vm135_vm2, %v382_v27 }
 0x2ae   :  { %v290_v29 = vpop.f32.mrb[2].mxu0 }
 0x2af   :  { %v291_v30 = vadd.f32 %v315_v28, %v290_v29  ;;  %v358_v31 = vpop.f32.mrb[3].mxu0 }
 0x2b1   :  { %295 = vst.msk [vmem:[#allocation5] sm:$0xff] %vm294_vm3, %v291_v30 }
 0x2b2   :  { %416 = shalt.err (!%p413_p12)
}
 0x2b3   :  { %s417_s15 = scalar_lea.hbm %s548_s7, 128 }
 0x2b4   :  { %p418_p13 = scmp.ne.s32.totalorder %s548_s7, %s417_s15  ;;  %p421_p0 = scmp.lt.u32.totalorder %s417_s15, %s548_s7 }
 0x2b6   :  { %p423_p1 = pnand %p421_p0, %p418_p13 }
 0x2b8   :  { %426 = shalt.err (!%p423_p1)
}
 0x2b9   :  { %305 = dma.vmem_to_hbm [thread:$0]  %s303_s12, 128, %s548_s7, [#allocation4]  }
 0x2ba   :  { %429 = dma.done.wait [#allocation4], 128  }
 0x2bb   :  { %430 = vsyncadd [#allocation4], 4294967168 }
 0x2bc   :  { %309 = vsyncpa [#allocation3], 1 }
 0x2bd   :  { %310 = vsyncpa [#allocation4], 1 }

</bundles_post_ra>
